<compile_context>
chip_gen: v6e
topology: v6e:2x2x1
jax: 0.10.0
libtpu: 0.0.40
codegen_flags: <defaults>
</compile_context>

<pallas_src>
import jax
import jax.numpy as jnp
from jax.experimental import pallas as pl
from jax.experimental.pallas import tpu as pltpu

_LANE = 128


def _round_up(a, b):
    return (a + b - 1) // b * b


def _encoder_kernel(x_ref, w1_ref, c1_ref, w2_ref, c2_ref, o_ref):
    # ---- FC_Block 1: (Linear + folded BN) -> ReLU, dropout = identity ----
    x = x_ref[...]                                                 # (tile_n, 128) bf16
    h = jnp.dot(x, w1_ref[...], preferred_element_type=jnp.float32)
    h = jnp.maximum(h + c1_ref[...], 0.0)                          # f32 epilogue
    # ---- FC_Block 2: (Linear + folded BN) -> ReLU, dropout = identity ----
    h = h.astype(w2_ref.dtype)                                     # bf16 for the MXU
    y = jnp.dot(h, w2_ref[...], preferred_element_type=jnp.float32)
    o_ref[...] = jnp.maximum(y + c2_ref[...], 0.0).astype(o_ref.dtype)


def continuous_encoder(x, params, *, tile_n_max=512):
    """Fused forward pass. x: (N, cont_dim) float32 -> (N, out_dim) float32."""
    (w1, b1, s1, t1, w2, b2, s2, t2) = params
    N, cont_dim = x.shape
    h_dim = w1.shape[1]
    out_dim = w2.shape[1]

    # --- fold BN into the Linear weights/bias (trace-time, free) ---
    w1f = w1 * s1                 # (cont_dim, h_dim) * (1, h_dim)
    c1 = b1 * s1 + t1             # (1, h_dim)
    w2f = w2 * s2                 # (h_dim, out_dim) * (1, out_dim)
    c2 = b2 * s2 + t2             # (1, out_dim)

    # --- zero-pad features to lane width, batch to the tile size ---
    cont_p = _round_up(cont_dim, _LANE)
    h_p = _round_up(h_dim, _LANE)
    out_p = _round_up(out_dim, _LANE)
    tile_n = min(tile_n_max, _round_up(N, 8))
    n_pad = _round_up(N, tile_n)

    x_p = jnp.pad(x, ((0, n_pad - N), (0, cont_p - cont_dim))).astype(jnp.bfloat16)
    w1p = jnp.pad(w1f, ((0, cont_p - cont_dim), (0, h_p - h_dim))).astype(jnp.bfloat16)
    c1p = jnp.pad(c1, ((0, 0), (0, h_p - h_dim)))                      # f32
    w2p = jnp.pad(w2f, ((0, h_p - h_dim), (0, out_p - out_dim))).astype(jnp.bfloat16)
    c2p = jnp.pad(c2, ((0, 0), (0, out_p - out_dim)))                  # f32

    grid = (n_pad // tile_n,)
    out_padded = pl.pallas_call(
        _encoder_kernel,
        out_shape=jax.ShapeDtypeStruct((n_pad, out_p), jnp.float32),
        grid=grid,
        in_specs=[
            pl.BlockSpec((tile_n, cont_p), lambda i: (i, 0)),   # x tile (pipelined)
            pl.BlockSpec((cont_p, h_p), lambda i: (0, 0)),      # w1 (resident)
            pl.BlockSpec((1, h_p), lambda i: (0, 0)),           # c1 (resident)
            pl.BlockSpec((h_p, out_p), lambda i: (0, 0)),       # w2 (resident)
            pl.BlockSpec((1, out_p), lambda i: (0, 0)),         # c2 (resident)
        ],
        out_specs=pl.BlockSpec((tile_n, out_p), lambda i: (i, 0)),
        compiler_params=pltpu.CompilerParams(
            dimension_semantics=("parallel",)),
    )(x_p, w1p, c1p, w2p, c2p)

    return out_padded[:N, :out_dim]


def init_params(key, cont_dim, h_dim, out_dim, eps=1e-5):
    """Deterministic synthetic parameters matching the module's shapes."""
    ks = jax.random.split(key, 10)

    def linear(kw, kb, fan_in, fan_out):
        bound = 1.0 / jnp.sqrt(fan_in)
        # torch Linear weight is (out, in); store transposed (in, out).
        w = jax.random.uniform(kw, (fan_in, fan_out), jnp.float32, -bound, bound)
        b = jax.random.uniform(kb, (1, fan_out), jnp.float32, -bound, bound)
        return w, b

    def bn(kg, kb, km, kv, dim):
        gamma = 1.0 + 0.1 * jax.random.normal(kg, (1, dim), jnp.float32)
        beta = 0.1 * jax.random.normal(kb, (1, dim), jnp.float32)
        running_mean = 0.1 * jax.random.normal(km, (1, dim), jnp.float32)
        running_var = jnp.abs(1.0 + 0.1 * jax.random.normal(kv, (1, dim), jnp.float32))
        scale = gamma / jnp.sqrt(running_var + eps)
        shift = beta - running_mean * scale
        return scale, shift

    w1, b1 = linear(ks[0], ks[1], cont_dim, h_dim)
    s1, t1 = bn(ks[2], ks[3], ks[4], ks[5], h_dim)
    w2, b2 = linear(ks[6], ks[7], h_dim, out_dim)
    s2, t2 = bn(ks[8], ks[9], ks[8], ks[9], out_dim)  # reuse keys deterministically
    return (w1, b1, s1, t1, w2, b2, s2, t2)


def reference_forward(x, params):
    """Plain-JAX f32 reference for correctness checking."""
    (w1, b1, s1, t1, w2, b2, s2, t2) = params
    h = jnp.maximum((x @ w1 + b1) * s1 + t1, 0.0)
    return jnp.maximum((h @ w2 + b2) * s2 + t2, 0.0)


if __name__ == "__main__":
    cont_dim, h_dim, out_dim = 16, 10, 32   # h_dim fixed to 10 by the module
    batch = 8

    key = jax.random.PRNGKey(0)
    kx, kp = jax.random.split(key)
    x = jax.random.normal(kx, (batch, cont_dim), jnp.float32)
    params = init_params(kp, cont_dim, h_dim, out_dim)

    out = continuous_encoder(x, params)
    out = jax.block_until_ready(out)

    ref = reference_forward(x, params)
    assert out.shape == (batch, out_dim)
    # bf16 operands with f32 accumulation -> loosened tolerance vs f32 reference.
    assert jnp.allclose(out, ref, atol=5e-2, rtol=5e-2), "mismatch vs reference"

    print("KERNEL_OK")
</pallas_src>

<mosaic_0001>
module attributes {stable_mosaic.version = 11 : i64} {
  func.func @_encoder_kernel(%arg0: i32, %arg1: memref<8x128xbf16, #tpu.memory_space<vmem>>, %arg2: memref<128x128xbf16, #tpu.memory_space<vmem>>, %arg3: memref<1x128xf32, #tpu.memory_space<vmem>>, %arg4: memref<128x128xbf16, #tpu.memory_space<vmem>>, %arg5: memref<1x128xf32, #tpu.memory_space<vmem>>, %arg6: memref<8x128xf32, #tpu.memory_space<vmem>>) attributes {dimension_semantics = [#tpu.dimension_semantics<parallel>], iteration_bounds = array<i64: 1>, scalar_prefetch = 0 : i64, scratch_operands = 0 : i64, tpu.core_type = #tpu.core_type<tc>, window_params = [{transform_indices = @transform_0, window_bounds = array<i64: 8, 128>}, {pipeline_mode = #tpu.pipeline_mode<synchronous>, transform_indices = @transform_1, window_bounds = array<i64: 128, 128>}, {pipeline_mode = #tpu.pipeline_mode<synchronous>, transform_indices = @transform_2, window_bounds = array<i64: 1, 128>}, {pipeline_mode = #tpu.pipeline_mode<synchronous>, transform_indices = @transform_3, window_bounds = array<i64: 128, 128>}, {pipeline_mode = #tpu.pipeline_mode<synchronous>, transform_indices = @transform_4, window_bounds = array<i64: 1, 128>}, {transform_indices = @transform_5, window_bounds = array<i64: 8, 128>}]} {
    %c0 = arith.constant 0 : index
    %c0_0 = arith.constant 0 : index
    %0 = vector.load %arg1[%c0, %c0_0] : memref<8x128xbf16, #tpu.memory_space<vmem>>, vector<8x128xbf16>
    %c0_1 = arith.constant 0 : index
    %c0_2 = arith.constant 0 : index
    %1 = vector.load %arg2[%c0_1, %c0_2] : memref<128x128xbf16, #tpu.memory_space<vmem>>, vector<128x128xbf16>
    %cst = arith.constant dense<0.000000e+00> : vector<8x128xf32>
    %2 = tpu.matmul %0, %1, %cst {dimension_numbers = #tpu.dot_dimension_numbers<[1], [0], [0], [1], [0, 0, 1, 1], [], []>} : vector<8x128xbf16>, vector<128x128xbf16>, vector<8x128xf32> -> vector<8x128xf32>
    %c0_3 = arith.constant 0 : index
    %c0_4 = arith.constant 0 : index
    %3 = vector.load %arg3[%c0_3, %c0_4] : memref<1x128xf32, #tpu.memory_space<vmem>>, vector<1x128xf32>
    %4 = vector.broadcast %3 : vector<1x128xf32> to vector<8x128xf32>
    %5 = arith.addf %2, %4 : vector<8x128xf32>
    %cst_5 = arith.constant 0.000000e+00 : f32
    %6 = vector.broadcast %cst_5 : f32 to vector<8x128xf32>
    %7 = arith.maximumf %5, %6 : vector<8x128xf32>
    %8 = arith.truncf %7 : vector<8x128xf32> to vector<8x128xbf16>
    %c0_6 = arith.constant 0 : index
    %c0_7 = arith.constant 0 : index
    %9 = vector.load %arg4[%c0_6, %c0_7] : memref<128x128xbf16, #tpu.memory_space<vmem>>, vector<128x128xbf16>
    %cst_8 = arith.constant dense<0.000000e+00> : vector<8x128xf32>
    %10 = tpu.matmul %8, %9, %cst_8 {dimension_numbers = #tpu.dot_dimension_numbers<[1], [0], [0], [1], [0, 0, 1, 1], [], []>} : vector<8x128xbf16>, vector<128x128xbf16>, vector<8x128xf32> -> vector<8x128xf32>
    %c0_9 = arith.constant 0 : index
    %c0_10 = arith.constant 0 : index
    %11 = vector.load %arg5[%c0_9, %c0_10] : memref<1x128xf32, #tpu.memory_space<vmem>>, vector<1x128xf32>
    %12 = vector.broadcast %11 : vector<1x128xf32> to vector<8x128xf32>
    %13 = arith.addf %10, %12 : vector<8x128xf32>
    %cst_11 = arith.constant 0.000000e+00 : f32
    %14 = vector.broadcast %cst_11 : f32 to vector<8x128xf32>
    %15 = arith.maximumf %13, %14 : vector<8x128xf32>
    %c0_12 = arith.constant 0 : index
    %c0_13 = arith.constant 0 : index
    %16 = vector.load %arg6[%c0_12, %c0_13] : memref<8x128xf32, #tpu.memory_space<vmem>>, vector<8x128xf32>
    tpu.vector_store %arg6[%c0_12, %c0_13], %15 {strides = array<i32>} : memref<8x128xf32, #tpu.memory_space<vmem>>, vector<8x128xf32>,
    return
  }
  func.func @transform_0(%arg0: i32) -> (i32, i32) {
    %c0_i32 = arith.constant 0 : i32
    %c0_i32_0 = arith.constant 0 : i32
    return %arg0, %c0_i32 : i32, i32
  }
  func.func @transform_1(%arg0: i32) -> (i32, i32) {
    %c0_i32 = arith.constant 0 : i32
    %c0_i32_0 = arith.constant 0 : i32
    %c0_i32_1 = arith.constant 0 : i32
    return %c0_i32, %c0_i32_0 : i32, i32
  }
  func.func @transform_2(%arg0: i32) -> (i32, i32) {
    %c0_i32 = arith.constant 0 : i32
    %c0_i32_0 = arith.constant 0 : i32
    %c0_i32_1 = arith.constant 0 : i32
    return %c0_i32, %c0_i32_0 : i32, i32
  }
  func.func @transform_3(%arg0: i32) -> (i32, i32) {
    %c0_i32 = arith.constant 0 : i32
    %c0_i32_0 = arith.constant 0 : i32
    %c0_i32_1 = arith.constant 0 : i32
    return %c0_i32, %c0_i32_0 : i32, i32
  }
  func.func @transform_4(%arg0: i32) -> (i32, i32) {
    %c0_i32 = arith.constant 0 : i32
    %c0_i32_0 = arith.constant 0 : i32
    %c0_i32_1 = arith.constant 0 : i32
    return %c0_i32, %c0_i32_0 : i32, i32
  }
  func.func @transform_5(%arg0: i32) -> (i32, i32) {
    %c0_i32 = arith.constant 0 : i32
    %c0_i32_0 = arith.constant 0 : i32
    return %arg0, %c0_i32 : i32, i32
  }
}

</mosaic_0001>

<bundles_post_ra>
// kernel: tpu_custom_call.1
= control target key start
LH: loop header
LB: loop body
LE: loop exit
PB: predicated region body
PF: predicated region fallthrough
CT: control target
= control target key end

     0   :  { %10 = vsyncpa [#allocation3], 0  ;;  %s546_s0 = inlined_call_operand.hbm [shape: bf16[8,128], index: 0, kind: input, shape index: {}]   ;;  %s547_s1 = inlined_call_operand.hbm [shape: bf16[128,128], index: 1, kind: input, shape index: {}]   ;;  %s548_s2 = inlined_call_operand.vmem [shape: f32[1,128], index: 2, kind: input, shape index: {}]   ;;  %s549_s3 = inlined_call_operand.hbm [shape: bf16[128,128], index: 3, kind: input, shape index: {}]   ;;  %s550_s4 = inlined_call_operand.vmem [shape: f32[1,128], index: 4, kind: input, shape index: {}]   ;;  %s551_s5 = inlined_call_operand.hbm [shape: f32[8,128], index: 5, kind: output, shape index: {}]  }
   0x1   :  { %11 = vsyncpa [#allocation6], 0 }
   0x2   :  { %12 = vsyncpa [#allocation4], 0  ;;  %s490_s18 = smov [#allocation5]  }
   0x3   :  { %s28_s19 = sshll.u32 %s490_s18, 4  ;;  %s29_s19 = int_to_ptr.vmem [resolvable:$true] %s28_s19 }
   0x4   :  { %s412_s20 = scalar_lea.vmem %s29_s19, 1024  ;;  %p417_p1 = scmp.lt.s32.totalorder %s29_s19, %s29_s19 }
   0x5   :  { %p413_p0 = scmp.ne.s32.totalorder %s29_s19, %s412_s20  ;;  %p418_p2 = scmp.lt.s32.totalorder %s412_s20, %s412_s20 }
   0x7   :  { %p419_p3 = por %p418_p2, %p417_p1 }
   0x9   :  { %p420_p4 = pnand %p419_p3, %p413_p0 }
   0xb   :  { %423 = shalt.err (!%p420_p4)
}
   0xc   :  { %s491_s21 = smov 64   ;;  %s492_s22 = smov 4  }
   0xd   :  { %34 = dma.hbm_to_vmem [thread:$0]  %s547_s1, 1024, %s29_s19, [#allocation6], %s491_s21, %s491_s21, %s492_s22  }
   0xe   :  { %s493_s25 = smov [#allocation2]   ;;  %s494_s27 = smov [#allocation7]  }
   0xf   :  { %s19_s26 = sshll.u32 %s493_s25, 4  ;;  %s42_s28 = sshll.u32 %s494_s27, 4  ;;  %s20_s26 = int_to_ptr.vmem [resolvable:$true] %s19_s26  ;;  %s43_s28 = int_to_ptr.vmem [resolvable:$true] %s42_s28 }
  0x10   :  { %s432_s29 = scalar_lea.vmem %s20_s26, 64  ;;  %p437_p6 = scmp.lt.s32.totalorder %s20_s26, %s20_s26 }
  0x11   :  { %p433_p5 = scmp.ne.s32.totalorder %s20_s26, %s432_s29  ;;  %p438_p7 = scmp.lt.s32.totalorder %s432_s29, %s432_s29 }
  0x13   :  { %p439_p8 = por %p438_p7, %p437_p6 }
  0x15   :  { %p440_p9 = pnand %p439_p8, %p433_p5 }
  0x17   :  { %443 = shalt.err (!%p440_p9)
}
  0x18   :  { %22 = dma.hbm_to_vmem [thread:$0]  %s546_s0, 64, %s20_s26, [#allocation3]  }
  0x19   :  { %s452_s7 = scalar_lea.vmem %s43_s28, 1024  ;;  %p457_p11 = scmp.lt.s32.totalorder %s43_s28, %s43_s28 }
  0x1a   :  { %p453_p10 = scmp.ne.s32.totalorder %s43_s28, %s452_s7  ;;  %p458_p12 = scmp.lt.s32.totalorder %s452_s7, %s452_s7 }
  0x1c   :  { %p459_p13 = por %p458_p12, %p457_p11 }
  0x1e   :  { %p460_p0 = pnand %p459_p13, %p453_p10 }
  0x20   :  { %463 = shalt.err (!%p460_p0)
}
  0x21   :  { %48 = dma.hbm_to_vmem [thread:$0]  %s549_s3, 1024, %s43_s28, [#allocation6], %s491_s21, %s491_s21, %s492_s22  }
  0x22   :  { %484 = dma.done.wait [#allocation3], 64  }
  0x23   :  { %485 = vsyncadd [#allocation3], 4294967232 }
  0x24   :  { %486 = dma.done.wait [#allocation6], 2048  }
  0x25   :  { %487 = vsyncadd [#allocation6], 4294965248  ;;  %v495_v0 = vmov 0.0   ;;  %vm496_vm0 = vmmov 0   ;;  %v388_v1 = vld [vmem:[#allocation5 + $0x38] sm:$0xff]   ;;  %v389_v2 = vld [vmem:[#allocation5 + $0x30] sm:$0xff]  }
  0x26   :  { %340 = vmatprep.subr.bf16.mxu0 %v495_v0  ;;  %356 = vmatprep.mubr.msk.bf16.mxu0 %vm496_vm0, %v495_v0  ;;  %v390_v3 = vld [vmem:[#allocation5 + $0x28] sm:$0xff]   ;;  %v396_v4 = vld [vmem:[#allocation7 + $0x38] sm:$0xff]   ;;  %v391_v5 = vld [vmem:[#allocation5 + $0x20] sm:$0xff]   ;;  %s497_s11 = smov [#allocation8]  }
  0x27   :  { %360 = vmatprep.subr.bf16.mxu1 %v495_v0  ;;  %376 = vmatprep.mubr.msk.bf16.mxu1 %vm496_vm0, %v495_v0  ;;  %v397_v6 = vld [vmem:[#allocation7 + $0x30] sm:$0xff]   ;;  %v392_v7 = vld [vmem:[#allocation5 + $0x18] sm:$0xff]   ;;  %v398_v8 = vld [vmem:[#allocation7 + $0x28] sm:$0xff]   ;;  %s294_s12 = sshll.u32 %s497_s11, 4  ;;  %s295_s12 = int_to_ptr.vmem [resolvable:$true] %s294_s12 }
  0x28   :  { %341 = vmatpush3.bf16.msra.mxu0 %v388_v1  ;;  %361 = vmatpush3.bf16.msra.mxu1 %v396_v4  ;;  %v393_v9 = vld [vmem:[#allocation5 + $0x10] sm:$0xff]   ;;  %v399_v10 = vld [vmem:[#allocation7 + $0x20] sm:$0xff]   ;;  %v394_v11 = vld [vmem:[#allocation5 + $0x8] sm:$0xff]   ;;  %p469_p2 = scmp.lt.s32.totalorder %s295_s12, %s295_s12 }
  0x29   :  { %342 = vmatprep.subr.bf16.mxu0 %v495_v0  ;;  %362 = vmatprep.subr.bf16.mxu1 %v495_v0  ;;  %v400_v12 = vld [vmem:[#allocation7 + $0x18] sm:$0xff]   ;;  %v395_v13 = vld [vmem:[#allocation5] sm:$0xff]   ;;  %v401_v14 = vld [vmem:[#allocation7 + $0x10] sm:$0xff]  }
  0x2a   :  { %v61_v15 = vld [vmem:[#allocation2] sm:$0xf]  ;;  %v402_v16 = vld [vmem:[#allocation7 + $0x8] sm:$0xff]   ;;  %v403_v17 = vld [vmem:[#allocation7] sm:$0xff]  }
  0x2b   :  { %v304_v18 = vld [vmem:[%s548_s2] ss:$0 sm:$0xff]  ;;  %s464_s2 = scalar_lea.vmem %s295_s12, 128 }
  0x2c   :  { %343 = vmatpush3.bf16.msra.mxu0 %v389_v2  ;;  %363 = vmatpush3.bf16.msra.mxu1 %v397_v6  ;;  %v313_v26 = vld [vmem:[%s550_s4] ss:$0 sm:$0xff]  ;;  %p465_p1 = scmp.ne.s32.totalorder %s295_s12, %s464_s2  ;;  %p470_p3 = scmp.lt.s32.totalorder %s464_s2, %s464_s2 }
  0x2d   :  { %344 = vmatprep.subr.bf16.mxu0 %v495_v0  ;;  %364 = vmatprep.subr.bf16.mxu1 %v495_v0 }
  0x2e   :  { %p471_p4 = por %p470_p3, %p469_p2 }
  0x30   :  { %345 = vmatpush3.bf16.msra.mxu0 %v390_v3  ;;  %365 = vmatpush3.bf16.msra.mxu1 %v398_v8  ;;  %p472_p5 = pnand %p471_p4, %p465_p1 }
  0x31   :  { %346 = vmatprep.subr.bf16.mxu0 %v495_v0  ;;  %366 = vmatprep.subr.bf16.mxu1 %v495_v0 }
  0x34   :  { %347 = vmatpush3.bf16.msra.mxu0 %v391_v5  ;;  %367 = vmatpush3.bf16.msra.mxu1 %v399_v10 }
  0x35   :  { %348 = vmatprep.subr.bf16.mxu0 %v495_v0  ;;  %368 = vmatprep.subr.bf16.mxu1 %v495_v0 }
  0x38   :  { %349 = vmatpush3.bf16.msra.mxu0 %v392_v7  ;;  %369 = vmatpush3.bf16.msra.mxu1 %v400_v12 }
  0x39   :  { %350 = vmatprep.subr.bf16.mxu0 %v495_v0  ;;  %370 = vmatprep.subr.bf16.mxu1 %v495_v0 }
  0x3c   :  { %351 = vmatpush3.bf16.msra.mxu0 %v393_v9  ;;  %371 = vmatpush3.bf16.msra.mxu1 %v401_v14 }
  0x3d   :  { %352 = vmatprep.subr.bf16.mxu0 %v495_v0  ;;  %372 = vmatprep.subr.bf16.mxu1 %v495_v0 }
  0x40   :  { %353 = vmatpush3.bf16.msra.mxu0 %v394_v11  ;;  %373 = vmatpush3.bf16.msra.mxu1 %v402_v16 }
  0x41   :  { %354 = vmatprep.subr.bf16.mxu0 %v495_v0  ;;  %374 = vmatprep.subr.bf16.mxu1 %v495_v0 }
  0x44   :  { %355 = vmatpush3.bf16.msra.mxu0 %v395_v13  ;;  %375 = vmatpush3.bf16.msra.mxu1 %v403_v17 }
  0x47   :  { %357 = vmatmul.mubr.bf16.vlgmr.msra.gmra.mxu0 %v61_v15 }
 0x107   :  { %v167_v19 = vpop.f32.mrf.mxu0 }
 0x108   :  { %v168_v20 = vadd.f32 %v304_v18, %v167_v19 }
 0x109   :  { %v358_v21 = vpop.f32.mrf.mxu0 }
 0x10a   :  { %v173_v22 = vmax.f32 %v168_v20, 0.0 }
 0x10b   :  { %v170_v23 = vpop.f32.mrf.mxu0 }
 0x10c   :  { %v174_v24 = vpack.c.bf16 %v173_v22, %v173_v22 }
 0x10d   :  { %v359_v25 = vpop.f32.mrf.mxu0 }
 0x10e   :  { %377 = vmatmul.mubr.bf16.vlgmr.msra.gmra.mxu1 %v174_v24 }
 0x1ce   :  { %v280_v27 = vpop.f32.mrf.mxu1 }
 0x1cf   :  { %v281_v28 = vadd.f32 %v313_v26, %v280_v27 }
 0x1d0   :  { %v378_v29 = vpop.f32.mrf.mxu1 }
 0x1d1   :  { %v286_v30 = vmax.f32 %v281_v28, 0.0 }
 0x1d2   :  { %v283_v31 = vpop.f32.mrf.mxu1 }
 0x1d3   :  { %287 = vst [vmem:[#allocation8] sm:$0xff] %v286_v30 }
 0x1d4   :  { %v379_v32 = vpop.f32.mrf.mxu1 }
 0x1d5   :  { %475 = shalt.err (!%p472_p5)
}
 0x1d6   :  { %297 = dma.vmem_to_hbm [thread:$0]  %s295_s12, 128, %s551_s5, [#allocation4]  }
 0x1d7   :  { %488 = dma.done.wait [#allocation4], 128  }
 0x1d8   :  { %489 = vsyncadd [#allocation4], 4294967168 }
 0x1d9   :  { %301 = vsyncpa [#allocation3], 1 }
 0x1da   :  { %302 = vsyncpa [#allocation6], 1 }
 0x1db   :  { %303 = vsyncpa [#allocation4], 1 }

</bundles_post_ra>
